<compile_context>
chip_gen: v6e
topology: v6e:2x2x1
jax: 0.10.0
libtpu: 0.0.40
codegen_flags: <defaults>
</compile_context>

<pallas_src>
import functools

import jax
import jax.numpy as jnp
from jax.experimental import pallas as pl
from jax.experimental.pallas import tpu as pltpu


# ----------------------------------------------------------------------------
# helpers
# ----------------------------------------------------------------------------
def _round_up(x, m):
    return ((x + m - 1) // m) * m


def _pad_tile(dim, max_tile, align):
    """Return (padded_dim, tile) with padded_dim % tile == 0, tile % align == 0."""
    dp = _round_up(dim, align)
    if dp <= max_tile:
        return dp, dp
    return _round_up(dim, max_tile), max_tile


# ----------------------------------------------------------------------------
# Pallas kernel: tiled matmul with fused bias / QuickGELU / residual epilogue
# ----------------------------------------------------------------------------
def _mm_kernel(a_ref, b_ref, bias_ref, o_ref, acc_ref, *, act):
    @pl.when(pl.program_id(2) == 0)
    def _():
        acc_ref[...] = jnp.zeros_like(acc_ref)

    acc_ref[...] += jnp.dot(a_ref[...], b_ref[...],
                            preferred_element_type=jnp.float32)

    @pl.when(pl.program_id(2) == pl.num_programs(2) - 1)
    def _():
        y = acc_ref[...] + bias_ref[...]
        if act == "quick_gelu":
            y = y * jax.nn.sigmoid(1.702 * y)
        o_ref[...] = y.astype(o_ref.dtype)


def _mm_res_kernel(a_ref, b_ref, bias_ref, r_ref, o_ref, acc_ref, *, act):
    @pl.when(pl.program_id(2) == 0)
    def _():
        acc_ref[...] = jnp.zeros_like(acc_ref)

    acc_ref[...] += jnp.dot(a_ref[...], b_ref[...],
                            preferred_element_type=jnp.float32)

    @pl.when(pl.program_id(2) == pl.num_programs(2) - 1)
    def _():
        y = acc_ref[...] + bias_ref[...]
        if act == "quick_gelu":
            y = y * jax.nn.sigmoid(1.702 * y)
        y = y + r_ref[...]
        o_ref[...] = y.astype(o_ref.dtype)


def matmul_bias_act(a, b, bias=None, act="none", residual=None):
    """y = act(a @ b + bias) [+ residual].  a:(M,K) b:(K,N) bias:(N,) -> (M,N) f32.

    bf16 MXU inputs, f32 accumulation, M/N/K tiling with VMEM accumulator scratch.
    """
    M, K = a.shape
    N = b.shape[1]

    Mp, TM = _pad_tile(M, 256, 8)
    Np, TN = _pad_tile(N, 256, 128)
    Kp, TK = _pad_tile(K, 512, 128)

    a_p = jnp.pad(a.astype(jnp.bfloat16), ((0, Mp - M), (0, Kp - K)))
    b_p = jnp.pad(b.astype(jnp.bfloat16), ((0, Kp - K), (0, Np - N)))
    if bias is None:
        bias = jnp.zeros((N,), jnp.float32)
    bias_p = jnp.pad(bias.astype(jnp.float32), (0, Np - N)).reshape(1, Np)

    in_specs = [
        pl.BlockSpec((TM, TK), lambda i, j, k: (i, k)),
        pl.BlockSpec((TK, TN), lambda i, j, k: (k, j)),
        pl.BlockSpec((1, TN), lambda i, j, k: (0, j)),
    ]
    args = [a_p, b_p, bias_p]

    if residual is not None:
        r_p = jnp.pad(residual.astype(jnp.float32), ((0, Mp - M), (0, Np - N)))
        in_specs.append(pl.BlockSpec((TM, TN), lambda i, j, k: (i, j)))
        args.append(r_p)
        kernel = functools.partial(_mm_res_kernel, act=act)
    else:
        kernel = functools.partial(_mm_kernel, act=act)

    out = pl.pallas_call(
        kernel,
        out_shape=jax.ShapeDtypeStruct((Mp, Np), jnp.float32),
        grid=(Mp // TM, Np // TN, Kp // TK),
        in_specs=in_specs,
        out_specs=pl.BlockSpec((TM, TN), lambda i, j, k: (i, j)),
        scratch_shapes=[pltpu.VMEM((TM, TN), jnp.float32)],
        compiler_params=pltpu.CompilerParams(
            dimension_semantics=("parallel", "parallel", "arbitrary")),
    )(*args)
    return out[:M, :N]


# ----------------------------------------------------------------------------
# Pallas kernel: LayerNorm (row-tiled)
# ----------------------------------------------------------------------------
def _layernorm_kernel(x_ref, g_ref, b_ref, o_ref):
    x = x_ref[...].astype(jnp.float32)
    mu = jnp.mean(x, axis=-1, keepdims=True)
    xc = x - mu
    var = jnp.mean(xc * xc, axis=-1, keepdims=True)
    inv = jax.lax.rsqrt(var + 1e-5)
    o_ref[...] = (xc * inv * g_ref[...] + b_ref[...]).astype(o_ref.dtype)


def layernorm(x, gamma, beta):
    """x: (M, C) -> (M, C) f32 LayerNorm over the last axis."""
    M, C = x.shape
    Mp, TM = _pad_tile(M, 512, 8)
    x_p = jnp.pad(x.astype(jnp.float32), ((0, Mp - M), (0, 0)))
    g = gamma.reshape(1, C).astype(jnp.float32)
    b = beta.reshape(1, C).astype(jnp.float32)
    out = pl.pallas_call(
        _layernorm_kernel,
        out_shape=jax.ShapeDtypeStruct((Mp, C), jnp.float32),
        grid=(Mp // TM,),
        in_specs=[
            pl.BlockSpec((TM, C), lambda i: (i, 0)),
            pl.BlockSpec((1, C), lambda i: (0, 0)),
            pl.BlockSpec((1, C), lambda i: (0, 0)),
        ],
        out_specs=pl.BlockSpec((TM, C), lambda i: (i, 0)),
        compiler_params=pltpu.CompilerParams(dimension_semantics=("parallel",)),
    )(x_p, g, b)
    return out[:M]


# ----------------------------------------------------------------------------
# Pallas kernel: multi-head attention core, blocked over batch*heads
# ----------------------------------------------------------------------------
def _attn_kernel(q_ref, k_ref, v_ref, o_ref, *, scale):
    q = (q_ref[...].astype(jnp.float32) * scale).astype(jnp.bfloat16)
    k = k_ref[...]
    v = v_ref[...]
    s = jnp.einsum("bqd,bkd->bqk", q, k, preferred_element_type=jnp.float32)
    s = s - jnp.max(s, axis=-1, keepdims=True)
    p = jnp.exp(s)
    p = p / jnp.sum(p, axis=-1, keepdims=True)
    o = jnp.einsum("bqk,bkd->bqd", p.astype(jnp.bfloat16), v,
                   preferred_element_type=jnp.float32)
    o_ref[...] = o.astype(o_ref.dtype)


def _bh_block(bh):
    for cand in (8, 4, 2):
        if bh % cand == 0 and bh // cand >= 2:
            return cand
    return bh


def attention(q, k, v):
    """q/k/v: (B*heads, L, Dh) -> (B*heads, L, Dh) f32, softmax(QK^T/sqrt(Dh)) V."""
    BH, L, Dh = q.shape
    BHB = _bh_block(BH)
    scale = float(Dh) ** -0.5
    kernel = functools.partial(_attn_kernel, scale=scale)
    return pl.pallas_call(
        kernel,
        out_shape=jax.ShapeDtypeStruct((BH, L, Dh), jnp.float32),
        grid=(BH // BHB,),
        in_specs=[
            pl.BlockSpec((BHB, L, Dh), lambda i: (i, 0, 0)),
            pl.BlockSpec((BHB, L, Dh), lambda i: (i, 0, 0)),
            pl.BlockSpec((BHB, L, Dh), lambda i: (i, 0, 0)),
        ],
        out_specs=pl.BlockSpec((BHB, L, Dh), lambda i: (i, 0, 0)),
        compiler_params=pltpu.CompilerParams(dimension_semantics=("parallel",)),
    )(q.astype(jnp.bfloat16), k.astype(jnp.bfloat16), v.astype(jnp.bfloat16))


# ----------------------------------------------------------------------------
# Parameters (synthetic, deterministic)
# ----------------------------------------------------------------------------
class ParamRng:
    def __init__(self, key):
        self.key = key

    def normal(self, shape, scale=1.0):
        self.key, sub = jax.random.split(self.key)
        return scale * jax.random.normal(sub, shape, dtype=jnp.float32)


def block_params(rng, d):
    return {
        "ln1_g": 1.0 + 0.05 * rng.normal((d,)), "ln1_b": 0.05 * rng.normal((d,)),
        "w_qkv": rng.normal((d, 3 * d), scale=d ** -0.5),
        "b_qkv": 0.02 * rng.normal((3 * d,)),
        "w_out": rng.normal((d, d), scale=d ** -0.5),
        "b_out": 0.02 * rng.normal((d,)),
        "ln2_g": 1.0 + 0.05 * rng.normal((d,)), "ln2_b": 0.05 * rng.normal((d,)),
        "w_fc": rng.normal((d, 4 * d), scale=d ** -0.5),
        "b_fc": 0.02 * rng.normal((4 * d,)),
        "w_proj": rng.normal((4 * d, d), scale=(4 * d) ** -0.5),
        "b_proj": 0.02 * rng.normal((d,)),
    }


def init_params(key, input_resolution, patch_size, width, layers, heads, output_dim):
    rng = ParamRng(key)
    scale = width ** -0.5
    n_patches = (input_resolution // patch_size) ** 2
    fan_in = 3 * patch_size * patch_size
    return {
        "patch_w": rng.normal((fan_in, width), scale=fan_in ** -0.5),
        "class_emb": scale * rng.normal((width,)),
        "pos_emb": scale * rng.normal((n_patches + 1, width)),
        "ln_pre_g": 1.0 + 0.05 * rng.normal((width,)),
        "ln_pre_b": 0.05 * rng.normal((width,)),
        "blocks": [block_params(rng, width) for _ in range(layers)],
        "ln_post_g": 1.0 + 0.05 * rng.normal((width,)),
        "ln_post_b": 0.05 * rng.normal((width,)),
        "proj": scale * rng.normal((width, output_dim)),
    }


# ----------------------------------------------------------------------------
# Forward pass (Pallas kernels + thin JAX glue)
# ----------------------------------------------------------------------------
def _patchify(x_nchw, ps):
    B, Cin, H, W = x_nchw.shape
    Hp, Wp = H // ps, W // ps
    p = x_nchw.reshape(B, Cin, Hp, ps, Wp, ps)
    p = p.transpose(0, 2, 4, 1, 3, 5).reshape(B * Hp * Wp, Cin * ps * ps)
    return p, (B, Hp * Wp)


def resblock_forward(x2, p, B, L, heads):
    C = x2.shape[1]
    Dh = C // heads

    h = layernorm(x2, p["ln1_g"], p["ln1_b"])
    qkv = matmul_bias_act(h, p["w_qkv"], p["b_qkv"])                 # (B*L, 3C)
    q, k, v = jnp.split(qkv, 3, axis=1)

    def to_heads(t):
        return t.reshape(B, L, heads, Dh).transpose(0, 2, 1, 3).reshape(B * heads, L, Dh)

    o = attention(to_heads(q), to_heads(k), to_heads(v))             # (B*heads, L, Dh)
    o = o.reshape(B, heads, L, Dh).transpose(0, 2, 1, 3).reshape(B * L, C)

    # out_proj + residual fused in one Pallas call
    x2 = matmul_bias_act(o, p["w_out"], p["b_out"], residual=x2)

    h = layernorm(x2, p["ln2_g"], p["ln2_b"])
    h = matmul_bias_act(h, p["w_fc"], p["b_fc"], act="quick_gelu")   # fc1 + QuickGELU
    x2 = matmul_bias_act(h, p["w_proj"], p["b_proj"], residual=x2)   # fc2 + residual
    return x2


def vit_forward(params, x_nchw, *, patch_size, heads):
    patches, (B, n_tok) = _patchify(x_nchw.astype(jnp.float32), patch_size)
    tok = matmul_bias_act(patches, params["patch_w"])                # (B*N, width)
    C = tok.shape[1]
    tok = tok.reshape(B, n_tok, C)

    cls = jnp.broadcast_to(params["class_emb"].reshape(1, 1, C), (B, 1, C))
    seq = jnp.concatenate([cls, tok], axis=1) + params["pos_emb"][None]
    L = seq.shape[1]

    x2 = layernorm(seq.reshape(B * L, C), params["ln_pre_g"], params["ln_pre_b"])
    for bp in params["blocks"]:
        x2 = resblock_forward(x2, bp, B, L, heads)

    cls_out = x2.reshape(B, L, C)[:, 0, :]                           # (B, C)
    cls_out = layernorm(cls_out, params["ln_post_g"], params["ln_post_b"])
    return matmul_bias_act(cls_out, params["proj"])                  # (B, output_dim)


# ----------------------------------------------------------------------------
# Pure-JAX reference (f32) for a correctness sanity check
# ----------------------------------------------------------------------------
def vit_reference(params, x_nchw, *, patch_size, heads):
    patches, (B, n_tok) = _patchify(x_nchw.astype(jnp.float32), patch_size)
    tok = patches @ params["patch_w"]
    C = tok.shape[1]
    tok = tok.reshape(B, n_tok, C)
    cls = jnp.broadcast_to(params["class_emb"].reshape(1, 1, C), (B, 1, C))
    h = jnp.concatenate([cls, tok], axis=1) + params["pos_emb"][None]
    L = h.shape[1]
    Dh = C // heads

    def ln(x, g, b):
        mu = x.mean(-1, keepdims=True)
        var = ((x - mu) ** 2).mean(-1, keepdims=True)
        return (x - mu) * jax.lax.rsqrt(var + 1e-5) * g + b

    h = ln(h, params["ln_pre_g"], params["ln_pre_b"])
    for p in params["blocks"]:
        y = ln(h, p["ln1_g"], p["ln1_b"])
        qkv = y @ p["w_qkv"] + p["b_qkv"]
        q, k, v = jnp.split(qkv, 3, axis=-1)
        q = q.reshape(B, L, heads, Dh).transpose(0, 2, 1, 3) * Dh ** -0.5
        k = k.reshape(B, L, heads, Dh).transpose(0, 2, 1, 3)
        v = v.reshape(B, L, heads, Dh).transpose(0, 2, 1, 3)
        a = jax.nn.softmax(jnp.einsum("bhqd,bhkd->bhqk", q, k), axis=-1)
        o = jnp.einsum("bhqk,bhkd->bhqd", a, v).transpose(0, 2, 1, 3).reshape(B, L, C)
        h = h + (o @ p["w_out"] + p["b_out"])
        y = ln(h, p["ln2_g"], p["ln2_b"])
        y = y @ p["w_fc"] + p["b_fc"]
        y = y * jax.nn.sigmoid(1.702 * y)
        h = h + (y @ p["w_proj"] + p["b_proj"])
    cls_out = ln(h[:, 0, :], params["ln_post_g"], params["ln_post_b"])
    return cls_out @ params["proj"]


# ----------------------------------------------------------------------------
if __name__ == "__main__":
    key = jax.random.PRNGKey(0)
    pkey, xkey = jax.random.split(key)

    # Small ViT config: 32x32 image, 8x8 patches -> 16 tokens + CLS = 17,
    # width=128 (lane-dense), 2 layers, 4 heads (head_dim=32), output_dim=128.
    input_resolution = 32
    patch_size = 8
    width = 128
    layers = 2
    heads = 4
    output_dim = 128
    batch = 2

    params = init_params(pkey, input_resolution, patch_size, width, layers, heads, output_dim)
    x = jax.random.normal(xkey, (batch, 3, input_resolution, input_resolution), dtype=jnp.float32)

    out = vit_forward(params, x, patch_size=patch_size, heads=heads)
    out = jax.block_until_ready(out)

    ref = jax.block_until_ready(vit_reference(params, x, patch_size=patch_size, heads=heads))
    rel_err = float(jnp.mean(jnp.abs(out - ref)) / (jnp.mean(jnp.abs(ref)) + 1e-6))

    assert out.shape == (batch, output_dim), out.shape
    assert bool(jnp.all(jnp.isfinite(out)))
    assert rel_err < 0.1, rel_err  # bf16 MXU vs f32 reference
    print("KERNEL_OK")
</pallas_src>

<mosaic_0001>
module attributes {stable_mosaic.version = 11 : i64} {
  func.func @_mm_kernel(%arg0: i32, %arg1: i32, %arg2: i32, %arg3: memref<32x256xbf16, #tpu.memory_space<vmem>>, %arg4: memref<256x128xbf16, #tpu.memory_space<vmem>>, %arg5: memref<1x128xf32, #tpu.memory_space<vmem>>, %arg6: memref<32x128xf32, #tpu.memory_space<vmem>>, %arg7: memref<32x128xf32, #tpu.memory_space<vmem>>) attributes {dimension_semantics = [#tpu.dimension_semantics<parallel>, #tpu.dimension_semantics<parallel>, #tpu.dimension_semantics<arbitrary>], iteration_bounds = array<i64: 1, 1, 1>, scalar_prefetch = 0 : i64, scratch_operands = 1 : i64, tpu.core_type = #tpu.core_type<tc>, window_params = [{transform_indices = @transform_0, window_bounds = array<i64: 32, 256>}, {transform_indices = @transform_1, window_bounds = array<i64: 256, 128>}, {transform_indices = @transform_2, window_bounds = array<i64: 1, 128>}, {transform_indices = @transform_3, window_bounds = array<i64: 32, 128>}]} {
    %c0_i32 = arith.constant 0 : i32
    %0 = arith.cmpi eq, %arg2, %c0_i32 : i32
    %1 = arith.extui %0 : i1 to i32
    %c0_i32_0 = arith.constant 0 : i32
    %2 = arith.cmpi ne, %1, %c0_i32_0 : i32
    scf.if %2 {
      %cst_10 = arith.constant 0.000000e+00 : f32
      %12 = vector.broadcast %cst_10 : f32 to vector<32x128xf32>
      %c0_11 = arith.constant 0 : index
      %c0_12 = arith.constant 0 : index
      %13 = vector.load %arg7[%c0_11, %c0_12] : memref<32x128xf32, #tpu.memory_space<vmem>>, vector<32x128xf32>
      tpu.vector_store %arg7[%c0_11, %c0_12], %12 {strides = array<i32>} : memref<32x128xf32, #tpu.memory_space<vmem>>, vector<32x128xf32>,
    } else {
    }
    %c0 = arith.constant 0 : index
    %c0_1 = arith.constant 0 : index
    %3 = vector.load %arg7[%c0, %c0_1] : memref<32x128xf32, #tpu.memory_space<vmem>>, vector<32x128xf32>
    %c0_2 = arith.constant 0 : index
    %c0_3 = arith.constant 0 : index
    %4 = vector.load %arg3[%c0_2, %c0_3] : memref<32x256xbf16, #tpu.memory_space<vmem>>, vector<32x256xbf16>
    %c0_4 = arith.constant 0 : index
    %c0_5 = arith.constant 0 : index
    %5 = vector.load %arg4[%c0_4, %c0_5] : memref<256x128xbf16, #tpu.memory_space<vmem>>, vector<256x128xbf16>
    %cst = arith.constant dense<0.000000e+00> : vector<32x128xf32>
    %6 = tpu.matmul %4, %5, %cst {dimension_numbers = #tpu.dot_dimension_numbers<[1], [0], [0], [1], [0, 0, 1, 1], [], []>} : vector<32x256xbf16>, vector<256x128xbf16>, vector<32x128xf32> -> vector<32x128xf32>
    %7 = arith.addf %3, %6 : vector<32x128xf32>
    %c0_6 = arith.constant 0 : index
    %c0_7 = arith.constant 0 : index
    %8 = vector.load %arg7[%c0_6, %c0_7] : memref<32x128xf32, #tpu.memory_space<vmem>>, vector<32x128xf32>
    tpu.vector_store %arg7[%c0_6, %c0_7], %7 {strides = array<i32>} : memref<32x128xf32, #tpu.memory_space<vmem>>, vector<32x128xf32>,
    %c0_i32_8 = arith.constant 0 : i32
    %9 = arith.cmpi eq, %arg2, %c0_i32_8 : i32
    %10 = arith.extui %9 : i1 to i32
    %c0_i32_9 = arith.constant 0 : i32
    %11 = arith.cmpi ne, %10, %c0_i32_9 : i32
    scf.if %11 {
      %c0_10 = arith.constant 0 : index
      %c0_11 = arith.constant 0 : index
      %12 = vector.load %arg7[%c0_10, %c0_11] : memref<32x128xf32, #tpu.memory_space<vmem>>, vector<32x128xf32>
      %c0_12 = arith.constant 0 : index
      %c0_13 = arith.constant 0 : index
      %13 = vector.load %arg5[%c0_12, %c0_13] : memref<1x128xf32, #tpu.memory_space<vmem>>, vector<1x128xf32>
      %14 = vector.broadcast %13 : vector<1x128xf32> to vector<32x128xf32>
      %15 = arith.addf %12, %14 : vector<32x128xf32>
      %c0_14 = arith.constant 0 : index
      %c0_15 = arith.constant 0 : index
      %16 = vector.load %arg6[%c0_14, %c0_15] : memref<32x128xf32, #tpu.memory_space<vmem>>, vector<32x128xf32>
      tpu.vector_store %arg6[%c0_14, %c0_15], %15 {strides = array<i32>} : memref<32x128xf32, #tpu.memory_space<vmem>>, vector<32x128xf32>,
    } else {
    }
    return
  }
  func.func @transform_0(%arg0: i32, %arg1: i32, %arg2: i32) -> (i32, i32) {
    %c0_i32 = arith.constant 0 : i32
    return %arg0, %arg2 : i32, i32
  }
  func.func @transform_1(%arg0: i32, %arg1: i32, %arg2: i32) -> (i32, i32) {
    %c0_i32 = arith.constant 0 : i32
    return %arg2, %arg1 : i32, i32
  }
  func.func @transform_2(%arg0: i32, %arg1: i32, %arg2: i32) -> (i32, i32) {
    %c0_i32 = arith.constant 0 : i32
    %c0_i32_0 = arith.constant 0 : i32
    return %c0_i32, %arg1 : i32, i32
  }
  func.func @transform_3(%arg0: i32, %arg1: i32, %arg2: i32) -> (i32, i32) {
    %c0_i32 = arith.constant 0 : i32
    return %arg0, %arg1 : i32, i32
  }
}

</mosaic_0001>

<bundles_post_ra>
// kernel: tpu_custom_call.1
= control target key start
LH: loop header
LB: loop body
LE: loop exit
PB: predicated region body
PF: predicated region fallthrough
CT: control target
= control target key end

     0   :  { %8 = vsyncpa [#allocation4], 0  ;;  %s510_s0 = inlined_call_operand.hbm [shape: bf16[32,256], index: 0, kind: input, shape index: {}]   ;;  %s511_s1 = inlined_call_operand.hbm [shape: bf16[256,128], index: 1, kind: input, shape index: {}]   ;;  %s512_s2 = inlined_call_operand.vmem [shape: f32[1,128], index: 2, kind: input, shape index: {}]   ;;  %s513_s3 = inlined_call_operand.hbm [shape: f32[32,128], index: 3, kind: output, shape index: {}]  }
   0x1   :  { %9 = vsyncpa [#allocation7], 0 }
   0x2   :  { %10 = vsyncpa [#allocation5], 0  ;;  %s465_s12 = smov [#allocation3]  }
   0x3   :  { %s16_s13 = sshll.u32 %s465_s12, 4  ;;  %s17_s13 = int_to_ptr.vmem [resolvable:$true] %s16_s13 }
   0x4   :  { %s407_s14 = scalar_lea.vmem %s17_s13, 512  ;;  %p412_p1 = scmp.lt.s32.totalorder %s17_s13, %s17_s13 }
   0x5   :  { %p408_p0 = scmp.ne.s32.totalorder %s17_s13, %s407_s14  ;;  %p413_p2 = scmp.lt.s32.totalorder %s407_s14, %s407_s14 }
   0x7   :  { %p414_p3 = por %p413_p2, %p412_p1 }
   0x9   :  { %p415_p4 = pnand %p414_p3, %p408_p0 }
   0xb   :  { %418 = shalt.err (!%p415_p4)
}
   0xc   :  { %s466_s15 = smov 128   ;;  %s467_s16 = smov 8  }
   0xd   :  { %22 = dma.hbm_to_vmem [thread:$0]  %s510_s0, 512, %s17_s13, [#allocation4], %s466_s15, %s466_s15, %s467_s16  }
   0xe   :  { %s468_s19 = smov [#allocation6]  }
   0xf   :  { %s28_s20 = sshll.u32 %s468_s19, 4  ;;  %s29_s20 = int_to_ptr.vmem [resolvable:$true] %s28_s20 }
  0x10   :  { %s427_s21 = scalar_lea.vmem %s29_s20, 2048  ;;  %p432_p6 = scmp.lt.s32.totalorder %s29_s20, %s29_s20 }
  0x11   :  { %p428_p5 = scmp.ne.s32.totalorder %s29_s20, %s427_s21  ;;  %p433_p7 = scmp.lt.s32.totalorder %s427_s21, %s427_s21 }
  0x13   :  { %p434_p8 = por %p433_p7, %p432_p6 }
  0x15   :  { %p435_p9 = pnand %p434_p8, %p428_p5 }
  0x17   :  { %438 = shalt.err (!%p435_p9)
}
  0x18   :  { %s469_s22 = smov 64   ;;  %s470_s23 = smov 4  }
  0x19   :  { %34 = dma.hbm_to_vmem [thread:$0]  %s511_s1, 2048, %s29_s20, [#allocation7], %s469_s22, %s469_s22, %s470_s23  }
  0x1a   :  { %459 = dma.done.wait [#allocation4], 512  }
  0x1b   :  { %460 = vsyncadd [#allocation4], 4294966784 }
  0x1c   :  { %461 = dma.done.wait [#allocation7], 2048  }
  0x1d   :  { %462 = vsyncadd [#allocation7], 4294965248  ;;  %v377_v0 = vld [vmem:[#allocation6 + $0x78] sm:$0xff]   ;;  %v379_v2 = vld [vmem:[#allocation6 + $0x70] sm:$0xff]   ;;  %s471_s26 = smov [#allocation8]  }
  0x1e   :  { %v378_v1 = vld [vmem:[#allocation6 + $0x38] sm:$0xff]   ;;  %326 = vmatprep.subr.bf16.mxu0 %v377_v0  ;;  %354 = vmatprep.subr.bf16.mxu1 %v377_v0  ;;  %v380_v3 = vld [vmem:[#allocation6 + $0x30] sm:$0xff]   ;;  %v381_v4 = vld [vmem:[#allocation6 + $0x68] sm:$0xff]   ;;  %s292_s27 = sshll.u32 %s471_s26, 4  ;;  %s293_s27 = int_to_ptr.vmem [resolvable:$true] %s292_s27 }
  0x1f   :  { %327 = vmatpush3.bf16.msra.mxu0 %v378_v1  ;;  %362 = vmatpush3.bf16.msra.mxu1 %v378_v1  ;;  %v382_v5 = vld [vmem:[#allocation6 + $0x28] sm:$0xff]   ;;  %v383_v6 = vld [vmem:[#allocation6 + $0x60] sm:$0xff]   ;;  %v385_v8 = vld [vmem:[#allocation6 + $0x58] sm:$0xff]   ;;  %p444_p11 = scmp.lt.s32.totalorder %s293_s27, %s293_s27 }
  0x20   :  { %328 = vmatprep.subr.bf16.mxu0 %v379_v2  ;;  %355 = vmatprep.subr.bf16.mxu1 %v379_v2  ;;  %v384_v7 = vld [vmem:[#allocation6 + $0x20] sm:$0xff]   ;;  %v386_v9 = vld [vmem:[#allocation6 + $0x18] sm:$0xff]   ;;  %v387_v10 = vld [vmem:[#allocation6 + $0x50] sm:$0xff]  }
  0x21   :  { %v395_v11 = vld [vmem:[#allocation3 + $0x4] ss:$8 sps:$4 sm:$0xff]   ;;  %v398_v12 = vld [vmem:[#allocation3 + $0x14] ss:$8 sps:$4 sm:$0xff]   ;;  %v393_v18 = vld [vmem:[#allocation3] ss:$8 sps:$4 sm:$0xff]  }
  0x22   :  { %v388_v13 = vld [vmem:[#allocation6 + $0x10] sm:$0xff]   ;;  %v389_v14 = vld [vmem:[#allocation6 + $0x48] sm:$0xff]   ;;  %240 = vmatprep.mubr.bf16.mxu0 %v395_v11  ;;  %248 = vmatprep.mubr.bf16.mxu1 %v398_v12  ;;  %v391_v16 = vld [vmem:[#allocation6 + $0x40] sm:$0xff]  }
  0x23   :  { %329 = vmatpush3.bf16.msra.mxu0 %v380_v3  ;;  %363 = vmatpush3.bf16.msra.mxu1 %v380_v3  ;;  %v390_v15 = vld [vmem:[#allocation6 + $0x8] sm:$0xff]   ;;  %v392_v17 = vld [vmem:[#allocation6] sm:$0xff]   ;;  %v396_v19 = vld [vmem:[#allocation3 + $0x10] ss:$8 sps:$4 sm:$0xff]  }
  0x24   :  { %330 = vmatprep.subr.bf16.mxu0 %v381_v4  ;;  %356 = vmatprep.subr.bf16.mxu1 %v381_v4  ;;  %v325_v23 = vld [vmem:[%s512_s2] ss:$0 sm:$0xff]  ;;  %s439_s2 = scalar_lea.vmem %s293_s27, 512 }
  0x25   :  { %p440_p10 = scmp.ne.s32.totalorder %s293_s27, %s439_s2  ;;  %p445_p12 = scmp.lt.s32.totalorder %s439_s2, %s439_s2 }
  0x27   :  { %331 = vmatpush3.bf16.msra.mxu0 %v382_v5  ;;  %364 = vmatpush3.bf16.msra.mxu1 %v382_v5  ;;  %p446_p13 = por %p445_p12, %p444_p11 }
  0x28   :  { %332 = vmatprep.subr.bf16.mxu0 %v383_v6  ;;  %357 = vmatprep.subr.bf16.mxu1 %v383_v6 }
  0x29   :  { %p447_p0 = pnand %p446_p13, %p440_p10 }
  0x2b   :  { %333 = vmatpush3.bf16.msra.mxu0 %v384_v7  ;;  %365 = vmatpush3.bf16.msra.mxu1 %v384_v7 }
  0x2c   :  { %334 = vmatprep.subr.bf16.mxu0 %v385_v8  ;;  %358 = vmatprep.subr.bf16.mxu1 %v385_v8 }
  0x2f   :  { %335 = vmatpush3.bf16.msra.mxu0 %v386_v9  ;;  %366 = vmatpush3.bf16.msra.mxu1 %v386_v9 }
  0x30   :  { %336 = vmatprep.subr.bf16.mxu0 %v387_v10  ;;  %359 = vmatprep.subr.bf16.mxu1 %v387_v10 }
  0x33   :  { %337 = vmatpush3.bf16.msra.mxu0 %v388_v13  ;;  %367 = vmatpush3.bf16.msra.mxu1 %v388_v13 }
  0x34   :  { %338 = vmatprep.subr.bf16.mxu0 %v389_v14  ;;  %360 = vmatprep.subr.bf16.mxu1 %v389_v14 }
  0x37   :  { %339 = vmatpush3.bf16.msra.mxu0 %v390_v15  ;;  %368 = vmatpush3.bf16.msra.mxu1 %v390_v15 }
  0x38   :  { %340 = vmatprep.subr.bf16.mxu0 %v391_v16  ;;  %361 = vmatprep.subr.bf16.mxu1 %v391_v16 }
  0x3b   :  { %341 = vmatpush3.bf16.msra.mxu0 %v392_v17  ;;  %369 = vmatpush3.bf16.msra.mxu1 %v392_v17 }
  0x3e   :  { %241 = vmatmul.mubr.bf16.vlgmr.msra.gmra.mxu0 %v393_v18  ;;  %249 = vmatmul.mubr.bf16.vlgmr.msra.gmra.mxu1 %v396_v19 }
  0xfe   :  { %v342_v20 = vpop.f32.mrf.mxu0  ;;  %v348_v21 = vpop.f32.mrf.mxu1 }
 0x100   :  { %v343_v22 = vpop.f32.mrf.mxu0  ;;  %v349_v24 = vpop.f32.mrf.mxu1 }
 0x101   :  { %v344_v25 = vadd.f32 %v343_v22, %v342_v20  ;;  %v350_v26 = vadd.f32 %v349_v24, %v348_v21 }
 0x102   :  { %v345_v27 = vpop.f32.mrf.mxu0  ;;  %v351_v28 = vpop.f32.mrf.mxu1 }
 0x103   :  { %v279_v29 = vadd.f32 %v344_v25, %v325_v23  ;;  %v281_v30 = vadd.f32 %v350_v26, %v325_v23 }
 0x104   :  { %v346_v31 = vpop.f32.mrf.mxu0  ;;  %v352_v32 = vpop.f32.mrf.mxu1 }
 0x105   :  { %283 = vst [vmem:[#allocation8] sm:$0xff] %v279_v29  ;;  %285 = vst [vmem:[#allocation8 + $0x10] sm:$0xff] %v281_v30  ;;  %v347_v33 = vadd.f32 %v346_v31, %v345_v27  ;;  %v353_v34 = vadd.f32 %v352_v32, %v351_v28 }
 0x107   :  { %v280_v35 = vadd.f32 %v347_v33, %v325_v23  ;;  %v282_v36 = vadd.f32 %v353_v34, %v325_v23 }
 0x109   :  { %284 = vst [vmem:[#allocation8 + $0x8] sm:$0xff] %v280_v35  ;;  %286 = vst [vmem:[#allocation8 + $0x18] sm:$0xff] %v282_v36 }
 0x10a   :  { %450 = shalt.err (!%p447_p0)
}
 0x10b   :  { %298 = dma.vmem_to_hbm [thread:$0]  %s293_s27, 512, %s513_s3, [#allocation5], %s466_s15, %s466_s15, %s467_s16  }
 0x10c   :  { %463 = dma.done.wait [#allocation5], 512  }
 0x10d   :  { %464 = vsyncadd [#allocation5], 4294966784 }
 0x10e   :  { %302 = vsyncpa [#allocation4], 1 }
 0x10f   :  { %303 = vsyncpa [#allocation7], 1 }
 0x110   :  { %304 = vsyncpa [#allocation5], 1 }

</bundles_post_ra>
